<compile_context>
chip_gen: v6e
topology: v6e:2x2x1
jax: 0.10.0
libtpu: 0.0.40
codegen_flags: <defaults>
</compile_context>

<pallas_src>
import math

import jax
import jax.numpy as jnp
from jax.experimental import pallas as pl
from jax.experimental.pallas import tpu as pltpu


def _round_up(x: int, m: int) -> int:
    return ((x + m - 1) // m) * m


def _make_kernel(g: int, half: int, dim: int):
    def kernel(t_ref, f_ref, o_ref):
        # t_ref: (TBG, g) f32    -- g logical timesteps folded per physical row
        # f_ref: (1, half) f32   -- resident frequencies (no exp in-kernel)
        # o_ref: (TBG, g*dim)    -- lane-dense output block
        t = t_ref[...]
        freqs = f_ref[...]
        for q in range(g):                       # unrolled at trace time (g small)
            args = t[:, q:q + 1] * freqs         # (TBG, half), exact f32 multiply
            base = q * dim
            o_ref[:, base:base + half] = jnp.sin(args).astype(o_ref.dtype)
            o_ref[:, base + half:base + dim] = jnp.cos(args).astype(o_ref.dtype)
    return kernel


def sinusoidal_position_embeddings(time: jax.Array, dim: int,
                                   batch_tile: int | None = None,
                                   out_dtype=jnp.float32) -> jax.Array:
    """time: (B,) -> (B, dim) embeddings in PyTorch cat(sin, cos) layout."""
    assert dim % 2 == 0, "dim must be even (cat(sin, cos) layout)"
    assert dim >= 4, "dim must be >= 4 (freqs divisor is half - 1)"

    batch = time.shape[0]
    half = dim // 2

    # Fold g logical rows per physical output row so the output's last dim is a
    # multiple of 128 (lane-dense stores, dense HBM writeback).
    g = 128 // math.gcd(dim, 128)
    lane_width = g * dim

    padded = _round_up(batch, g)
    rows = padded // g

    t = time.astype(jnp.float32).reshape(batch)
    if padded != batch:                          # at most g-1 extra scalars
        t = jnp.pad(t, (0, padded - batch))
    t_fold = t.reshape(rows, g)

    # Precompute frequencies once in plain JAX (no exp inside the kernel).
    neg = -(math.log(10000.0) / (half - 1))
    freqs = jnp.exp(jnp.arange(half, dtype=jnp.float32) * neg).reshape(1, half)

    # --- batch tile (in folded rows; always a multiple of 8 sublanes) -------
    if batch_tile is not None:
        tbg = max(8, _round_up(pl.cdiv(max(int(batch_tile), 1), g), 8))
    else:
        bytes_per_row = lane_width * 4
        tbg = max(8, ((4 << 20) // bytes_per_row) // 8 * 8)   # ~4 MiB out / step
        if rows >= 16:
            # keep >= 2 grid steps so v7x can split work across both TCs
            tbg = min(tbg, _round_up(pl.cdiv(rows, 2), 8))
    tbg = max(8, min(tbg, _round_up(rows, 8)))

    grid = (pl.cdiv(rows, tbg),)

    out = pl.pallas_call(
        _make_kernel(g, half, dim),
        out_shape=jax.ShapeDtypeStruct((rows, lane_width), out_dtype),
        grid=grid,
        in_specs=[
            pl.BlockSpec((tbg, g), lambda i: (i, 0)),        # folded time tile
            pl.BlockSpec((1, half), lambda i: (0, 0)),       # resident freqs
        ],
        out_specs=pl.BlockSpec((tbg, lane_width), lambda i: (i, 0)),
        compiler_params=pltpu.CompilerParams(
            dimension_semantics=("parallel",)),
    )(t_fold, freqs)

    emb = out.reshape(padded, dim)               # free row-major un-fold
    return emb[:batch] if padded != batch else emb


def _reference(time: jax.Array, dim: int) -> jax.Array:
    half = dim // 2
    emb = math.log(10000.0) / (half - 1)
    freqs = jnp.exp(jnp.arange(half, dtype=jnp.float32) * -emb)
    args = time.astype(jnp.float32)[:, None] * freqs[None, :]
    return jnp.concatenate([jnp.sin(args), jnp.cos(args)], axis=-1)


if __name__ == "__main__":
    # Primary check: B=8, dim=32 (typical diffusion time-embedding size).
    B, DIM = 8, 32
    key = jax.random.PRNGKey(0)
    time = jax.random.uniform(key, (B,), dtype=jnp.float32) * 1000.0

    out = jax.block_until_ready(sinusoidal_position_embeddings(time, DIM))
    ref = _reference(time, DIM)
    assert out.shape == (B, DIM), out.shape
    assert jnp.allclose(out, ref, atol=1e-5, rtol=1e-5), "mismatch vs reference"

    # Edge-block / padding path: batch not a multiple of the fold factor g=4.
    B2 = 10
    time2 = jax.random.uniform(jax.random.PRNGKey(1), (B2,), dtype=jnp.float32) * 1000.0
    out2 = jax.block_until_ready(sinusoidal_position_embeddings(time2, DIM))
    assert out2.shape == (B2, DIM), out2.shape
    assert jnp.allclose(out2, _reference(time2, DIM), atol=1e-5, rtol=1e-5)

    # dim already a multiple of 128 (g == 1, no folding, aligned half stores).
    DIM3 = 256
    out3 = jax.block_until_ready(sinusoidal_position_embeddings(time, DIM3))
    assert out3.shape == (B, DIM3), out3.shape
    assert jnp.allclose(out3, _reference(time, DIM3), atol=1e-5, rtol=1e-5)

    print("KERNEL_OK")
</pallas_src>

<mosaic_0001>
module attributes {stable_mosaic.version = 11 : i64} {
  func.func @kernel(%arg0: i32, %arg1: memref<8x4xf32, #tpu.memory_space<vmem>>, %arg2: memref<1x16xf32, #tpu.memory_space<vmem>>, %arg3: memref<8x128xf32, #tpu.memory_space<vmem>>) attributes {dimension_semantics = [#tpu.dimension_semantics<parallel>], iteration_bounds = array<i64: 1>, scalar_prefetch = 0 : i64, scratch_operands = 0 : i64, tpu.core_type = #tpu.core_type<tc>, window_params = [{transform_indices = @transform_0, window_bounds = array<i64: 8, 4>}, {pipeline_mode = #tpu.pipeline_mode<synchronous>, transform_indices = @transform_1, window_bounds = array<i64: 1, 16>}, {transform_indices = @transform_2, window_bounds = array<i64: 8, 128>}]} {
    %c0 = arith.constant 0 : index
    %c0_0 = arith.constant 0 : index
    %0 = vector.load %arg1[%c0, %c0_0] : memref<8x4xf32, #tpu.memory_space<vmem>>, vector<8x4xf32>
    %c0_1 = arith.constant 0 : index
    %c0_2 = arith.constant 0 : index
    %1 = vector.load %arg2[%c0_1, %c0_2] : memref<1x16xf32, #tpu.memory_space<vmem>>, vector<1x16xf32>
    %2 = vector.extract_strided_slice %0 {offsets = [0, 0], sizes = [8, 1], strides = [1, 1]} : vector<8x4xf32> to vector<8x1xf32>
    %3 = vector.broadcast %2 : vector<8x1xf32> to vector<8x16xf32>
    %4 = vector.broadcast %1 : vector<1x16xf32> to vector<8x16xf32>
    %5 = arith.mulf %3, %4 : vector<8x16xf32>
    %6 = math.sin %5 : vector<8x16xf32>
    %c0_3 = arith.constant 0 : index
    %c0_4 = arith.constant 0 : index
    %7 = vector.load %arg3[%c0_3, %c0_4] : memref<8x128xf32, #tpu.memory_space<vmem>>, vector<8x16xf32>
    tpu.vector_store %arg3[%c0_3, %c0_4], %6 {strides = array<i32>} : memref<8x128xf32, #tpu.memory_space<vmem>>, vector<8x16xf32>,
    %8 = math.cos %5 : vector<8x16xf32>
    %c0_5 = arith.constant 0 : index
    %c16 = arith.constant 16 : index
    %9 = vector.load %arg3[%c0_5, %c16] : memref<8x128xf32, #tpu.memory_space<vmem>>, vector<8x16xf32>
    tpu.vector_store %arg3[%c0_5, %c16], %8 {strides = array<i32>} : memref<8x128xf32, #tpu.memory_space<vmem>>, vector<8x16xf32>,
    %10 = vector.extract_strided_slice %0 {offsets = [0, 1], sizes = [8, 1], strides = [1, 1]} : vector<8x4xf32> to vector<8x1xf32>
    %11 = vector.broadcast %10 : vector<8x1xf32> to vector<8x16xf32>
    %12 = vector.broadcast %1 : vector<1x16xf32> to vector<8x16xf32>
    %13 = arith.mulf %11, %12 : vector<8x16xf32>
    %14 = math.sin %13 : vector<8x16xf32>
    %c0_6 = arith.constant 0 : index
    %c32 = arith.constant 32 : index
    %15 = vector.load %arg3[%c0_6, %c32] : memref<8x128xf32, #tpu.memory_space<vmem>>, vector<8x16xf32>
    tpu.vector_store %arg3[%c0_6, %c32], %14 {strides = array<i32>} : memref<8x128xf32, #tpu.memory_space<vmem>>, vector<8x16xf32>,
    %16 = math.cos %13 : vector<8x16xf32>
    %c0_7 = arith.constant 0 : index
    %c48 = arith.constant 48 : index
    %17 = vector.load %arg3[%c0_7, %c48] : memref<8x128xf32, #tpu.memory_space<vmem>>, vector<8x16xf32>
    tpu.vector_store %arg3[%c0_7, %c48], %16 {strides = array<i32>} : memref<8x128xf32, #tpu.memory_space<vmem>>, vector<8x16xf32>,
    %18 = vector.extract_strided_slice %0 {offsets = [0, 2], sizes = [8, 1], strides = [1, 1]} : vector<8x4xf32> to vector<8x1xf32>
    %19 = vector.broadcast %18 : vector<8x1xf32> to vector<8x16xf32>
    %20 = vector.broadcast %1 : vector<1x16xf32> to vector<8x16xf32>
    %21 = arith.mulf %19, %20 : vector<8x16xf32>
    %22 = math.sin %21 : vector<8x16xf32>
    %c0_8 = arith.constant 0 : index
    %c64 = arith.constant 64 : index
    %23 = vector.load %arg3[%c0_8, %c64] : memref<8x128xf32, #tpu.memory_space<vmem>>, vector<8x16xf32>
    tpu.vector_store %arg3[%c0_8, %c64], %22 {strides = array<i32>} : memref<8x128xf32, #tpu.memory_space<vmem>>, vector<8x16xf32>,
    %24 = math.cos %21 : vector<8x16xf32>
    %c0_9 = arith.constant 0 : index
    %c80 = arith.constant 80 : index
    %25 = vector.load %arg3[%c0_9, %c80] : memref<8x128xf32, #tpu.memory_space<vmem>>, vector<8x16xf32>
    tpu.vector_store %arg3[%c0_9, %c80], %24 {strides = array<i32>} : memref<8x128xf32, #tpu.memory_space<vmem>>, vector<8x16xf32>,
    %26 = vector.extract_strided_slice %0 {offsets = [0, 3], sizes = [8, 1], strides = [1, 1]} : vector<8x4xf32> to vector<8x1xf32>
    %27 = vector.broadcast %26 : vector<8x1xf32> to vector<8x16xf32>
    %28 = vector.broadcast %1 : vector<1x16xf32> to vector<8x16xf32>
    %29 = arith.mulf %27, %28 : vector<8x16xf32>
    %30 = math.sin %29 : vector<8x16xf32>
    %c0_10 = arith.constant 0 : index
    %c96 = arith.constant 96 : index
    %31 = vector.load %arg3[%c0_10, %c96] : memref<8x128xf32, #tpu.memory_space<vmem>>, vector<8x16xf32>
    tpu.vector_store %arg3[%c0_10, %c96], %30 {strides = array<i32>} : memref<8x128xf32, #tpu.memory_space<vmem>>, vector<8x16xf32>,
    %32 = math.cos %29 : vector<8x16xf32>
    %c0_11 = arith.constant 0 : index
    %c112 = arith.constant 112 : index
    %33 = vector.load %arg3[%c0_11, %c112] : memref<8x128xf32, #tpu.memory_space<vmem>>, vector<8x16xf32>
    tpu.vector_store %arg3[%c0_11, %c112], %32 {strides = array<i32>} : memref<8x128xf32, #tpu.memory_space<vmem>>, vector<8x16xf32>,
    return
  }
  func.func @transform_0(%arg0: i32) -> (i32, i32) {
    %c0_i32 = arith.constant 0 : i32
    %c0_i32_0 = arith.constant 0 : i32
    return %arg0, %c0_i32 : i32, i32
  }
  func.func @transform_1(%arg0: i32) -> (i32, i32) {
    %c0_i32 = arith.constant 0 : i32
    %c0_i32_0 = arith.constant 0 : i32
    %c0_i32_1 = arith.constant 0 : i32
    return %c0_i32, %c0_i32_0 : i32, i32
  }
  func.func @transform_2(%arg0: i32) -> (i32, i32) {
    %c0_i32 = arith.constant 0 : i32
    %c0_i32_0 = arith.constant 0 : i32
    return %arg0, %c0_i32 : i32, i32
  }
}

</mosaic_0001>

<bundles_post_ra>
// kernel: tpu_custom_call.1
= control target key start
LH: loop header
LB: loop body
LE: loop exit
PB: predicated region body
PF: predicated region fallthrough
CT: control target
= control target key end

     0   :  { %7 = vsyncpa [#allocation3], 0  ;;  %s1403_s0 = inlined_call_operand.hbm [shape: f32[2,4], index: 0, kind: input, shape index: {}]   ;;  %s1404_s1 = inlined_call_operand.vmem [shape: f32[1,16], index: 1, kind: input, shape index: {}]   ;;  %s1405_s2 = inlined_call_operand.hbm [shape: f32[2,128], index: 2, kind: output, shape index: {}]  }
   0x1   :  { %8 = vsyncpa [#allocation4], 0 }
   0x2   :  { %13 = vsyncadd [#allocation3], 96  ;;  %s1078_s9 = smov [#allocation2]  }
   0x3   :  { %s14_s10 = sshll.u32 %s1078_s9, 4  ;;  %s15_s10 = int_to_ptr.vmem [resolvable:$true] %s14_s10 }
   0x4   :  { %s1042_s11 = scalar_lea.vmem %s15_s10, 32  ;;  %s1046_s12 = scalar_lea.vmem %s15_s10, 128 }
   0x5   :  { %p1043_p0 = scmp.ne.s32.totalorder %s15_s10, %s1042_s11  ;;  %p1047_p1 = scmp.lt.s32.totalorder %s15_s10, %s15_s10 }
   0x6   :  { %p1048_p2 = scmp.lt.s32.totalorder %s1046_s12, %s1042_s11 }
   0x8   :  { %p1049_p3 = por %p1048_p2, %p1047_p1 }
   0xa   :  { %p1050_p4 = pnand %p1049_p3, %p1043_p0 }
   0xc   :  { %1053 = shalt.err (!%p1050_p4)
}
   0xd   :  { %s1079_s13 = smov 32   ;;  %s1080_s14 = smov 2  }
   0xe   :  { %20 = dma.hbm_to_vmem [thread:$0]  %s1403_s0, 32, %s15_s10, [#allocation3], %s1079_s13, %s1079_s13, %s1080_s14  }
   0xf   :  { %1074 = dma.done.wait [#allocation3], 128  }
  0x10   :  { %1075 = vsyncadd [#allocation3], 4294967168  ;;  %v1081_v0 = vmov 2   ;;  %v1082_v1 = vmov 0   ;;  %v26_v2 = vld [vmem:[#allocation2] sm:$0xff]  ;;  %v1083_v3 = vmov 3  }
  0x11   :  { %1015 = vset.pattern.permute.xlu1 %v1081_v0  ;;  %1013 = vset.pattern.permute.xlu0 %v1082_v1  ;;  %v1084_v4 = vmov 1   ;;  %v944_v5 = vld [vmem:[%s1404_s1] ss:$0 sm:$0xff]  ;;  %v1085_v42 = vmov 683565275   ;;  %s1091_s0 = smov 16  }
  0x12   :  { %480 = vperm.xlu1 %1015, %v26_v2   ;;  %30 = vperm.xlu0 %1013, %v26_v2   ;;  %v1086_v44 = vmov 2475754826   ;;  %v1087_v46 = vmov 2131351028   ;;  %v1088_v48 = vmov 2102212464  }
  0x13   :  { %v1089_v50 = vmov 920167782   ;;  %v1090_v58 = vmov 1326507024   ;;  %s1092_s1 = smov 48   ;;  %s1093_s19 = smov 80  }
  0x14   :  { %s1094_s20 = smov 64   ;;  %s1095_s21 = smov 112  }
  0x15   :  { %s1096_s22 = smov 96  }
  0x16   :  { %1016 = vset.pattern.permute.xlu1 %v1083_v3  ;;  %1014 = vset.pattern.permute.xlu0 %v1084_v4 }
  0x17   :  { %704 = vperm.xlu1 %1016, %v26_v2   ;;  %256 = vperm.xlu0 %1014, %v26_v2  }
  0x1b   :  { %1017 = vset.pattern.permute.xlu0 %v1083_v3 }
  0x8d   :  { %v481_v6 = vpop.permute.xlu1 %480  ;;  %v31_v7 = vpop.permute.xlu0 %30 }
  0x8e   :  { %v1122_v8 = vmul.f32 %v944_v5, %v481_v6  ;;  %v1124_v9 = vmul.f32 %v944_v5, %v31_v7 }
  0x90   :  { %v484_v10 = vand.u32 2147483647, %v1122_v8  ;;  %v487_v11 = vand.u32 2139095040, %v1122_v8  ;;  %v40_v12 = vand.u32 2147483647, %v1124_v9  ;;  %v43_v13 = vand.u32 2139095040, %v1124_v9 }
  0x92   :  { %v488_v14 = vshrl.u32 %v487_v11, 23  ;;  %v491_v15 = vand.u32 8388607, %v484_v10  ;;  %v47_v16 = vand.u32 8388607, %v40_v12  ;;  %v705_v17 = vpop.permute.xlu1 %704  ;;  %v44_v18 = vshrl.u32 %v43_v13, 23  ;;  %v257_v21 = vpop.permute.xlu0 %256 }
  0x93   :  { %v1134_v19 = vmul.f32 %v944_v5, %v705_v17  ;;  %v1138_v30 = vmul.f32 %v944_v5, %v257_v21 }
  0x94   :  { %v961_v20 = vadd.s32 4294967169, %v488_v14  ;;  %v492_v22 = vor.u32 8388608, %v491_v15  ;;  %v945_v23 = vadd.s32 4294967169, %v44_v18  ;;  %v48_v26 = vor.u32 8388608, %v47_v16 }
  0x95   :  { %v711_v24 = vand.u32 2139095040, %v1134_v19  ;;  %v708_v28 = vand.u32 2147483647, %v1134_v19  ;;  %v263_v40 = vand.u32 2139095040, %v1138_v30 }
  0x96   :  { %v494_v25 = vadd.s32 1, %v961_v20  ;;  %v50_v27 = vadd.s32 1, %v945_v23  ;;  %v1140_v32 = vshll.u32 %v492_v22, 8  ;;  %v1142_v36 = vshll.u32 %v48_v26, 8 }
  0x97   :  { %v712_v29 = vshrl.u32 %v711_v24, 23  ;;  %v1148_v39 = vand.u32 8388607, %v708_v28 }
  0x98   :  { %vm495_vm0 = vcmp.gt.s32.totalorder %v494_v25, 0  ;;  %vm51_vm1 = vcmp.gt.s32.totalorder %v50_v27, 0 }
  0x99   :  { %v496_v31 = vsel %vm495_vm0, %v494_v25, 0  ;;  %v52_v35 = vsel %vm51_vm1, %v50_v27, 0  ;;  %v969_v38 = vadd.s32 4294967169, %v712_v29 }
  0x9a   :  { %v497_v33 = vshrl.u32 %v496_v31, 5  ;;  %v498_v34 = vand.u32 31, %v496_v31  ;;  %v1144_v37 = vand.u32 31, %v52_v35  ;;  %v1156_v52 = vshrl.u32 %v52_v35, 5 }
  0x9b   :  { %v718_v2 = vadd.s32 1, %v969_v38 }
  0x9c   :  { %v499_v41 = vsub.s32 32, %v498_v34  ;;  %v501_v43 = vshll.u32 %v1085_v42, %v498_v34  ;;  %v504_v45 = vshll.u32 %v1086_v44, %v498_v34  ;;  %v507_v47 = vshll.u32 %v1087_v46, %v498_v34 }
  0x9d   :  { %v510_v49 = vshll.u32 %v1088_v48, %v498_v34  ;;  %v513_v51 = vshll.u32 %v1089_v50, %v498_v34  ;;  %vm516_vm2 = vcmp.lt.s32.totalorder %v497_v33, 1  ;;  %vm518_vm3 = vcmp.lt.s32.totalorder %v497_v33, 3 }
  0x9e   :  { %v500_v53 = vshrl.u32 %v1085_v42, %v499_v41  ;;  %v502_v54 = vshrl.u32 %v1086_v44, %v499_v41  ;;  %v505_v55 = vshrl.u32 %v1087_v46, %v499_v41  ;;  %v508_v56 = vshrl.u32 %v1088_v48, %v499_v41 }
  0x9f   :  { %v511_v57 = vshrl.u32 %v1089_v50, %v499_v41  ;;  %v514_v59 = vshrl.u32 %v1090_v58, %v499_v41  ;;  %vm519_vm4 = vcmp.lt.s32.totalorder %v497_v33, 4  ;;  %v55_v63 = vsub.s32 32, %v1144_v37 }
  0xa0   :  { %v503_v60 = vor.u32 %v502_v54, %v501_v43  ;;  %v506_v61 = vor.u32 %v505_v55, %v504_v45  ;;  %v509_v62 = vor.u32 %v508_v56, %v507_v47  ;;  %vm517_vm5 = vcmp.lt.s32.totalorder %v497_v33, 2 }
  0xa1   :  { %v512_v0 = vor.u32 %v511_v57, %v510_v49  ;;  %v515_v1 = vor.u32 %v514_v59, %v513_v51  ;;  %v57_v14 = vshll.u32 %v1085_v42, %v1144_v37  ;;  %v58_v17 = vshrl.u32 %v1086_v44, %v55_v63 }
  0xa2   :  { %v520_v3 = vsel %vm516_vm2, %v500_v53, %v503_v60  ;;  %v521_v4 = vsel %vm519_vm4, %v509_v62, 2102212464  ;;  %v524_v5 = vsel %vm516_vm2, %v503_v60, %v506_v61  ;;  %v528_v6 = vsel %vm516_vm2, %v506_v61, %v509_v62 }
  0xa3   :  { %v522_v7 = vsel %vm518_vm3, %v506_v61, %v521_v4  ;;  %v525_v11 = vsel %vm519_vm4, %v512_v0, 920167782  ;;  %v529_v13 = vsel %vm519_vm4, %v515_v1, 1326507024  ;;  %v60_v18 = vshll.u32 %v1086_v44, %v1144_v37 }
  0xa4   :  { %v526_v15 = vsel %vm518_vm3, %v509_v62, %v525_v11  ;;  %v530_v16 = vsel %vm518_vm3, %v512_v0, %v529_v13  ;;  %v523_v20 = vsel %vm517_vm5, %v520_v3, %v522_v7  ;;  %v61_v23 = vshrl.u32 %v1087_v46, %v55_v63 }
  0xa5   :  { %v527_v21 = vsel %vm517_vm5, %v524_v5, %v526_v15  ;;  %v531_v22 = vsel %vm517_vm5, %v528_v6, %v530_v16  ;;  %v59_v29 = vor.u32 %v58_v17, %v57_v14  ;;  %v63_v34 = vshll.u32 %v1087_v46, %v1144_v37 }
  0xa6   :  { %v1181_v24 = vmul.u32.u64.low %v1140_v32, %v531_v22  ;;  %v1182_v25 = vmul.u32.u64.high %v1140_v32, %v531_v22, %v1181_v24  ;;  %v1185_v26 = vmul.u32.u64.low %v1140_v32, %v527_v21  ;;  %v1186_v27 = vmul.u32.u64.high %v1140_v32, %v527_v21, %v1185_v26 }
  0xa7   :  { %v62_v31 = vor.u32 %v61_v23, %v60_v18  ;;  %v64_v35 = vshrl.u32 %v1088_v48, %v55_v63  ;;  %v56_v33 = vshrl.u32 %v1085_v42, %v55_v63  ;;  %v66_v38 = vshll.u32 %v1088_v48, %v1144_v37 }
  0xa8   :  { %v67_v41 = vshrl.u32 %v1089_v50, %v55_v63  ;;  %v70_v43 = vshrl.u32 %v1090_v58, %v55_v63  ;;  %v539_v45 = vmul.u32 %v1140_v32, %v523_v20  ;;  %v69_v49 = vshll.u32 %v1089_v50, %v1144_v37 }
  0xa9   :  { %v65_v47 = vor.u32 %v64_v35, %v63_v34  ;;  %vm72_vm6 = vcmp.lt.s32.totalorder %v1156_v52, 1  ;;  %vm541_vm7 = vc.u32 %v1182_v25, %v1185_v26  ;;  %v542_v51 = vadd.s32 1, %v1186_v27 }
  0xaa   :  { %v68_v53 = vor.u32 %v67_v41, %v66_v38  ;;  %vm73_vm8 = vcmp.lt.s32.totalorder %v1156_v52, 2  ;;  %v71_v54 = vor.u32 %v70_v43, %v69_v49  ;;  %vm74_vm9 = vcmp.lt.s32.totalorder %v1156_v52, 3 }
  0xab   :  { %vm75_vm10 = vcmp.lt.s32.totalorder %v1156_v52, 4  ;;  %v80_v32 = vsel %vm72_vm6, %v59_v29, %v62_v31  ;;  %v543_v55 = vsel %vm541_vm7, %v542_v51, %v1186_v27  ;;  %v84_v57 = vsel %vm72_vm6, %v62_v31, %v65_v47 }
  0xac   :  { %v77_v56 = vsel %vm75_vm10, %v65_v47, 2102212464  ;;  %v81_v37 = vsel %vm75_vm10, %v68_v53, 920167782  ;;  %v544_v59 = vadd.s32 %v543_v55, %v539_v45  ;;  %v76_v60 = vsel %vm72_vm6, %v56_v33, %v59_v29 }
  0xad   :  { %v82_v61 = vsel %vm74_vm9, %v65_v47, %v81_v37  ;;  %v85_v62 = vsel %vm75_vm10, %v71_v54, 1326507024  ;;  %v78_v63 = vsel %vm74_vm9, %v62_v31, %v77_v56  ;;  %vm719_vm11 = vcmp.gt.s32.totalorder %v718_v2, 0 }
  0xae   :  { %v83_v0 = vsel %vm73_vm8, %v80_v32, %v82_v61  ;;  %v86_v1 = vsel %vm74_vm9, %v68_v53, %v85_v62  ;;  %v545_v3 = vadd.s32 536870912, %v544_v59  ;;  %v720_v13 = vsel %vm719_vm11, %v718_v2, 0 }
  0xaf   :  { %v87_v4 = vsel %vm73_vm8, %v84_v57, %v86_v1  ;;  %v1213_v5 = vmul.u32.u64.low %v1142_v36, %v83_v0  ;;  %v1214_v6 = vmul.u32.u64.high %v1142_v36, %v83_v0, %v1213_v5  ;;  %v79_v15 = vsel %vm73_vm8, %v76_v60, %v78_v63 }
  0xb0   :  { %v1218_v7 = vmul.u32.u64.low %v1142_v36, %v87_v4  ;;  %v1219_v11 = vmul.u32.u64.high %v1142_v36, %v87_v4, %v1218_v7  ;;  %v1221_v14 = vshrl.u32 %v545_v3, 30  ;;  %v722_v16 = vand.u32 31, %v720_v13 }
  0xb1   :  { %v716_v17 = vor.u32 8388608, %v1148_v39  ;;  %v260_v18 = vand.u32 2147483647, %v1138_v30  ;;  %v264_v20 = vshrl.u32 %v263_v40, 23  ;;  %v98_v22 = vadd.s32 1, %v1214_v6 }
  0xb2   :  { %v547_v21 = vshll.u32 %v1221_v14, 30  ;;  %v723_v23 = vsub.s32 32, %v722_v16  ;;  %v725_v2 = vshll.u32 %v1085_v42, %v722_v16  ;;  %v95_v24 = vmul.u32 %v1142_v36, %v79_v15 }
  0xb3   :  { %vm97_vm12 = vc.u32 %v1219_v11, %v1213_v5  ;;  %v728_v52 = vshll.u32 %v1086_v44, %v722_v16  ;;  %v731_v39 = vshll.u32 %v1087_v46, %v722_v16  ;;  %v721_v29 = vshrl.u32 %v720_v13, 5 }
  0xb4   :  { %v1237_v27 = vsub.s32 %v544_v59, %v547_v21  ;;  %v99_v40 = vsel %vm97_vm12, %v98_v22, %v1214_v6  ;;  %v726_v31 = vshrl.u32 %v1086_v44, %v723_v23  ;;  %v729_v35 = vshrl.u32 %v1087_v46, %v723_v23 }
  0xb5   :  { %v100_v34 = vadd.s32 %v99_v40, %v95_v24  ;;  %v732_v33 = vshrl.u32 %v1088_v48, %v723_v23  ;;  %v734_v36 = vshll.u32 %v1088_v48, %v722_v16  ;;  %v735_v43 = vshrl.u32 %v1089_v50, %v723_v23 }
  0xb6   :  { %v550_v38 = vsub.s32 0, %v1237_v27  ;;  %v727_v41 = vor.u32 %v726_v31, %v725_v2  ;;  %v737_v45 = vshll.u32 %v1089_v50, %v722_v16  ;;  %v730_v49 = vor.u32 %v729_v35, %v728_v52 }
  0xb7   :  { %v101_v47 = vadd.s32 536870912, %v100_v34  ;;  %v733_v51 = vor.u32 %v732_v33, %v731_v39  ;;  %v738_v53 = vshrl.u32 %v1090_v58, %v723_v23  ;;  %v724_v32 = vshrl.u32 %v1085_v42, %v723_v23 }
  0xb8   :  { %v962_v54 = vmin.u32 %v550_v38, %v1237_v27  ;;  %v736_v55 = vor.u32 %v735_v43, %v734_v36  ;;  %vm740_vm13 = vcmp.lt.s32.totalorder %v721_v29, 1  ;;  %vm742_vm14 = vcmp.lt.s32.totalorder %v721_v29, 3 }
  0xb9   :  { %v1250_v56 = vshrl.u32 %v101_v47, 30  ;;  %v739_v37 = vor.u32 %v738_v53, %v737_v45  ;;  %vm743_vm15 = vcmp.lt.s32.totalorder %v721_v29, 4  ;;  %vm741_vm0 = vcmp.lt.s32.totalorder %v721_v29, 2 }
  0xba   :  { %v552_v57 = vclz %v962_v54  ;;  %v745_v59 = vsel %vm743_vm15, %v733_v51, 2102212464  ;;  %v748_v60 = vsel %vm740_vm13, %v727_v41, %v730_v49  ;;  %v749_v62 = vsel %vm743_vm15, %v736_v55, 920167782 }
  0xbb   :  { %v103_v61 = vshll.u32 %v1250_v56, 30  ;;  %v752_v63 = vsel %vm740_vm13, %v730_v49, %v733_v51  ;;  %v756_v0 = vshll.u32 %v716_v17, 8  ;;  %v744_v1 = vsel %vm740_vm13, %v724_v32, %v727_v41 }
  0xbc   :  { %v750_v3 = vsel %vm742_vm14, %v733_v51, %v749_v62  ;;  %v753_v4 = vsel %vm743_vm15, %v739_v37, 1326507024  ;;  %v953_v6 = vadd.s32 4294967169, %v264_v20  ;;  %v746_v13 = vsel %vm742_vm14, %v730_v49, %v745_v59 }
  0xbd   :  { %v104_v7 = vsub.s32 %v100_v34, %v103_v61  ;;  %v751_v15 = vsel %vm741_vm0, %v748_v60, %v750_v3  ;;  %v754_v16 = vsel %vm742_vm14, %v736_v55, %v753_v4  ;;  %v963_v21 = vadd.s32 4294967294, %v552_v57 }
  0xbe   :  { %v755_v22 = vsel %vm741_vm0, %v752_v63, %v754_v16  ;;  %v1258_v23 = vmul.u32.u64.low %v756_v0, %v751_v15  ;;  %v1259_v2 = vmul.u32.u64.high %v756_v0, %v751_v15, %v1258_v23  ;;  %v747_v20 = vsel %vm741_vm0, %v744_v1, %v746_v13 }
  0xbf   :  { %v106_v17 = vsub.s32 0, %v104_v7  ;;  %v1262_v24 = vmul.u32.u64.low %v756_v0, %v755_v22  ;;  %v1263_v52 = vmul.u32.u64.high %v756_v0, %v755_v22, %v1262_v24  ;;  %v270_v39 = vadd.s32 1, %v953_v6 }
  0xc0   :  { %vm964_vm1 = vcmp.lt.s32.totalorder %v963_v21, 0  ;;  %v766_v31 = vadd.s32 1, %v1259_v2  ;;  %v267_v34 = vand.u32 8388607, %v260_v18  ;;  %v763_v33 = vmul.u32 %v756_v0, %v747_v20 }
  0xc1   :  { %v946_v40 = vmin.u32 %v106_v17, %v104_v7  ;;  %vm271_vm2 = vcmp.gt.s32.totalorder %v270_v39, 0  ;;  %vm765_vm3 = vc.u32 %v1263_v52, %v1258_v23  ;;  %v1272_v41 = vsel %vm964_vm1, 0, %v963_v21 }
  0xc2   :  { %v272_v36 = vsel %vm271_vm2, %v270_v39, 0  ;;  %v767_v38 = vsel %vm765_vm3, %v766_v31, %v1259_v2  ;;  %v268_v49 = vor.u32 8388608, %v267_v34  ;;  %v560_v53 = vsub.s32 4294967266, %v1272_v41 }
  0xc3   :  { %v108_v35 = vclz %v946_v40  ;;  %v768_v43 = vadd.s32 %v767_v38, %v763_v33  ;;  %v274_v45 = vand.u32 31, %v272_v36  ;;  %v96_v54 = vadd.s32 %v1213_v5, %v1219_v11 }
  0xc4   :  { %v273_v55 = vshrl.u32 %v272_v36, 5  ;;  %v308_v15 = vshll.u32 %v268_v49, 8  ;;  %vm42_vm5 = vcmp.lt.s32.totalorder %v1124_v9, 0  ;;  %vm41_vm11 = vcmp.le.f32.partialorder %v40_v12, 0.7853982 }
  0xc5   :  { %v947_v29 = vadd.s32 4294967294, %v108_v35  ;;  %v769_v47 = vadd.s32 536870912, %v768_v43  ;;  %v275_v51 = vsub.s32 32, %v274_v45  ;;  %v277_v60 = vshll.u32 %v1085_v42, %v274_v45 }
  0xc6   :  { %v280_v63 = vshll.u32 %v1086_v44, %v274_v45  ;;  %v283_v13 = vshll.u32 %v1087_v46, %v274_v45  ;;  %v286_v22 = vshll.u32 %v1088_v48, %v274_v45  ;;  %v289_v17 = vshll.u32 %v1089_v50, %v274_v45 }
  0xc7   :  { %vm948_vm4 = vcmp.lt.s32.totalorder %v947_v29, 0  ;;  %v1277_v59 = vshrl.u32 %v769_v47, 30  ;;  %v278_v62 = vshrl.u32 %v1086_v44, %v275_v51  ;;  %v281_v0 = vshrl.u32 %v1087_v46, %v275_v51 }
  0xc8   :  { %v111_v32 = vsel %vm948_vm4, 0, %v947_v29  ;;  %v284_v5 = vshrl.u32 %v1088_v48, %v275_v51  ;;  %v287_v2 = vshrl.u32 %v1089_v50, %v275_v51  ;;  %v290_v24 = vshrl.u32 %v1090_v58, %v275_v51 }
  0xc9   :  { %v112_v37 = vsub.s32 32, %v111_v32  ;;  %v116_v57 = vsub.s32 4294967266, %v111_v32  ;;  %v113_v61 = vshll.u32 %v104_v7, %v111_v32  ;;  %v771_v4 = vshll.u32 %v1277_v59, 30 }
  0xca   :  { %v279_v11 = vor.u32 %v278_v62, %v277_v60  ;;  %v282_v6 = vor.u32 %v281_v0, %v280_v63  ;;  %v285_v44 = vor.u32 %v284_v5, %v283_v13  ;;  %v276_v46 = vshrl.u32 %v1085_v42, %v275_v51 }
  0xcb   :  { %v114_v1 = vshrl.u32 %v96_v54, %v112_v37  ;;  %v117_v3 = vadd.s32 127, %v116_v57  ;;  %v1286_v7 = vsub.s32 %v768_v43, %v771_v4  ;;  %vm292_vm6 = vcmp.lt.s32.totalorder %v273_v55, 1 }
  0xcc   :  { %v288_v31 = vor.u32 %v287_v2, %v286_v22  ;;  %v291_v34 = vor.u32 %v290_v24, %v289_v17  ;;  %vm294_vm7 = vcmp.lt.s32.totalorder %v273_v55, 3  ;;  %vm295_vm8 = vcmp.lt.s32.totalorder %v273_v55, 4 }
  0xcd   :  { %v115_v16 = vor.u32 %v114_v1, %v113_v61  ;;  %v118_v21 = vshll.u32 %v117_v3, 23  ;;  %v774_v39 = vsub.s32 0, %v1286_v7  ;;  %v300_v33 = vsel %vm292_vm6, %v279_v11, %v282_v6 }
  0xce   :  { %v297_v36 = vsel %vm295_vm8, %v285_v44, 2102212464  ;;  %v301_v50 = vsel %vm295_vm8, %v288_v31, 920167782  ;;  %v304_v58 = vsel %vm292_vm6, %v282_v6, %v285_v44  ;;  %v305_v38 = vsel %vm295_vm8, %v291_v34, 1326507024 }
  0xcf   :  { %v119_v20 = vor.u32 4788187, %v118_v21  ;;  %v122_v40 = vcvt.s32.f32 %v115_v16  ;;  %v970_v35 = vmin.u32 %v774_v39, %v1286_v7  ;;  %vm293_vm9 = vcmp.lt.s32.totalorder %v273_v55, 2 }
  0xd0   :  { %v302_v42 = vsel %vm294_vm7, %v285_v44, %v301_v50  ;;  %v296_v45 = vsel %vm292_vm6, %v276_v46, %v279_v11  ;;  %v306_v49 = vsel %vm294_vm7, %v288_v31, %v305_v38  ;;  %v126_v51 = vsub.s32 4, %v1250_v56 }
  0xd1   :  { %v120_v48 = vand.u32 2147483647, %v119_v20  ;;  %v776_v43 = vclz %v970_v35  ;;  %v303_v47 = vsel %vm293_vm9, %v300_v33, %v302_v42  ;;  %v298_v37 = vsel %vm294_vm7, %v282_v6, %v297_v36 }
  0xd2   :  { %v307_v57 = vsel %vm293_vm9, %v304_v58, %v306_v49  ;;  %v1306_v62 = vmul.u32.u64.low %v308_v15, %v303_v47  ;;  %v1307_v63 = vmul.u32.u64.high %v308_v15, %v303_v47, %v1306_v62  ;;  %v299_v1 = vsel %vm293_vm9, %v296_v45, %v298_v37 }
  0xd3   :  { %v123_v29 = vmul.f32 %v122_v40, %v120_v48  ;;  %v971_v32 = vadd.s32 4294967294, %v776_v43  ;;  %v1303_v60 = vmul.u32.u64.low %v308_v15, %v307_v57  ;;  %v1304_v61 = vmul.u32.u64.high %v308_v15, %v307_v57, %v1303_v60 }
  0xd4   :  { %v561_v55 = vadd.s32 127, %v560_v53  ;;  %v127_v4 = vsel %vm42_vm5, %v126_v51, %v1250_v56  ;;  %v318_v11 = vadd.s32 1, %v1307_v63  ;;  %v315_v6 = vmul.u32 %v308_v15, %v299_v1 }
  0xd5   :  { %v124_v54 = vxor.u32 2147483648, %v123_v29  ;;  %vm972_vm10 = vcmp.lt.s32.totalorder %v971_v32, 0  ;;  %vm317_vm12 = vc.u32 %v1304_v61, %v1306_v62  ;;  %v129_v13 = vsel %vm41_vm11, 0, %v127_v4 }
  0xd6   :  { %v779_v5 = vsel %vm972_vm10, 0, %v971_v32  ;;  %v319_v12 = vsel %vm317_vm12, %v318_v11, %v1307_v63  ;;  %v556_v53 = vsub.s32 32, %v1272_v41  ;;  %v562_v22 = vshll.u32 %v561_v55, 23 }
  0xd7   :  { %v125_v0 = vsel %vm42_vm5, %v124_v54, %v123_v29  ;;  %v784_v16 = vsub.s32 4294967266, %v779_v5  ;;  %v320_v21 = vadd.s32 %v319_v12, %v315_v6  ;;  %v133_v2 = vadd.s32 3, %v129_v13 }
  0xd8   :  { %v128_v3 = vsel %vm41_vm11, %v1124_v9, %v125_v0  ;;  %v540_v56 = vadd.s32 %v1185_v26, %v1182_v25  ;;  %v563_v39 = vor.u32 4788187, %v562_v22  ;;  %v780_v46 = vsub.s32 32, %v779_v5 }
  0xd9   :  { %1018 = vcosq.f32 %v128_v3  ;;  %v321_v44 = vadd.s32 536870912, %v320_v21  ;;  %v785_v17 = vadd.s32 127, %v784_v16  ;;  %v134_v40 = vand.u32 3, %v133_v2 }
  0xda   :  { %1020 = vsinq.f32 %v128_v3  ;;  %v558_v20 = vshrl.u32 %v540_v56, %v556_v53  ;;  %v557_v31 = vshll.u32 %v1237_v27, %v1272_v41  ;;  %v239_v34 = vand.u32 3, %v129_v13 }
  0xdb   :  { %v1327_v24 = vshrl.u32 %v321_v44, 30  ;;  %v764_v48 = vadd.s32 %v1258_v23, %v1263_v52  ;;  %v786_v35 = vshll.u32 %v785_v17, 23  ;;  %vm144_vm13 = vcmask 130048  }
  0xdc   :  { %v559_v26 = vor.u32 %v558_v20, %v557_v31  ;;  %v564_v36 = vand.u32 2147483647, %v563_v39  ;;  %v781_v50 = vshll.u32 %v1286_v7, %v779_v5  ;;  %vm132_vm14 = vweird.f32 %v1124_v9 }
  0xdd   :  { %v323_v15 = vshll.u32 %v1327_v24, 30  ;;  %v782_v38 = vshrl.u32 %v764_v48, %v780_v46  ;;  %vm136_vm15 = vcmp.eq.s32.totalorder %v134_v40, 0  ;;  %vm139_vm0 = vcmp.eq.s32.totalorder %v134_v40, 2 }
  0xde   :  { %vm241_vm1 = vcmp.eq.s32.totalorder %v239_v34, 0  ;;  %vm244_vm2 = vcmp.eq.s32.totalorder %v239_v34, 2  ;;  %v787_v23 = vor.u32 4788187, %v786_v35  ;;  %vm135_vm3 = vcmp.lt.s32.totalorder %v134_v40, 2 }
  0xdf   :  { %v324_v33 = vsub.s32 %v320_v21, %v323_v15  ;;  %vm240_vm4 = vcmp.lt.s32.totalorder %v239_v34, 2  ;;  %v783_v7 = vor.u32 %v782_v38, %v781_v50  ;;  %v566_v32 = vcvt.s32.f32 %v559_v26 }
  0xe0   :  { %v788_v60 = vand.u32 2147483647, %v787_v23  ;;  %v316_v4 = vadd.s32 %v1306_v62, %v1304_v61  ;;  %vm486_vm6 = vcmp.lt.s32.totalorder %v1122_v8, 0  ;;  %vm710_vm7 = vcmp.lt.s32.totalorder %v1134_v19, 0 }
  0xe1   :  { %v326_v29 = vsub.s32 0, %v324_v33  ;;  %v567_v0 = vmul.f32 %v566_v32, %v564_v36  ;;  %v790_v1 = vcvt.s32.f32 %v783_v7  ;;  %vm1349_vm8 = vcmp.le.f32.partialorder %v484_v10, 0.7853982 }
  0xe2   :  { %v570_v39 = vsub.s32 4, %v1221_v14  ;;  %vm1361_vm9 = vcmp.le.f32.partialorder %v708_v28, 0.7853982  ;;  %v346_v40 = vsub.s32 4, %v1327_v24  ;;  %vm262_vm10 = vcmp.lt.s32.totalorder %v1138_v30, 0 }
  0xe3   :  { %v954_v52 = vmin.u32 %v326_v29, %v324_v33  ;;  %v791_v55 = vmul.f32 %v790_v1, %v788_v60  ;;  %v568_v6 = vxor.u32 2147483648, %v567_v0  ;;  %vm261_vm11 = vcmp.le.f32.partialorder %v260_v18, 0.7853982 }
  0xe4   :  { %v571_v28 = vsel %vm486_vm6, %v570_v39, %v1221_v14  ;;  %v794_v48 = vsub.s32 4, %v1277_v59  ;;  %v347_v35 = vsel %vm262_vm10, %v346_v40, %v1327_v24  ;;  %vm352_vm12 = vweird.f32 %v1138_v30 }
  0xe5   :  { %v328_v49 = vclz %v954_v52  ;;  %v792_v16 = vxor.u32 2147483648, %v791_v55  ;;  %v569_v22 = vsel %vm486_vm6, %v568_v6, %v567_v0 }
  0xe6   :  { %v1019_v25 = vpop.eup %1018  ;;  %v572_v17 = vsel %vm1349_vm8, %v1122_v8, %v569_v22  ;;  %v795_v18 = vsel %vm710_vm7, %v794_v48, %v1277_v59 }
  0xe7   :  { %v1021_v58 = vpop.eup %1020  ;;  %v140_v43 = vxor.u32 2147483648, %v1019_v25  ;;  %v955_v63 = vadd.s32 4294967294, %v328_v49  ;;  %v793_v62 = vsel %vm710_vm7, %v792_v16, %v791_v55  ;;  %1022 = vcosq.f32 %v572_v17 }
  0xe8   :  { %v137_v27 = vxor.u32 2147483648, %v1021_v58  ;;  %v796_v10 = vsel %vm1361_vm9, %v1134_v19, %v793_v62  ;;  %1024 = vsinq.f32 %v572_v17  ;;  %v797_v36 = vsel %vm1361_vm9, 0, %v795_v18 }
  0xe9   :  { %v246_v41 = vsel %vm244_vm2, %v140_v43, %v1021_v58  ;;  %v141_v42 = vsel %vm139_vm0, %v140_v43, %v1021_v58  ;;  %vm956_vm5 = vcmp.lt.s32.totalorder %v955_v63, 0  ;;  %1026 = vcosq.f32 %v796_v10 }
  0xea   :  { %v243_v45 = vsel %vm241_vm1, %v1019_v25, %v137_v27  ;;  %v138_v47 = vsel %vm136_vm15, %v1019_v25, %v137_v27  ;;  %v331_v3 = vsel %vm956_vm5, 0, %v955_v63  ;;  %1028 = vsinq.f32 %v796_v10 }
  0xeb   :  { %v247_v51 = vsel %vm240_vm4, %v243_v45, %v246_v41  ;;  %v142_v54 = vsel %vm135_vm3, %v138_v47, %v141_v42  ;;  %v332_v5 = vsub.s32 32, %v331_v3  ;;  %v336_v11 = vsub.s32 4294967266, %v331_v3 }
  0xec   :  { %v248_v37 = vsel %vm132_vm14, nan, %v247_v51  ;;  %v143_v57 = vsel %vm132_vm14, nan, %v142_v54  ;;  %v333_v12 = vshll.u32 %v324_v33, %v331_v3  ;;  %v573_v33 = vsel %vm1349_vm8, 0, %v571_v28 }
  0xed   :  { %250 = vrot.lane.b32.xlu1 %v248_v37, %s1091_s0  ;;  %145 = vst.msk [vmem:[#allocation5] sm:$0xff] %vm144_vm13, %v143_v57  ;;  %v334_v9 = vshrl.u32 %v316_v4, %v332_v5  ;;  %v337_v13 = vadd.s32 127, %v336_v11  ;;  %v349_v25 = vsel %vm261_vm11, 0, %v347_v35  ;;  %v577_v26 = vadd.s32 3, %v573_v33 }
  0xee   :  { %v353_v14 = vadd.s32 3, %v349_v25  ;;  %v687_v50 = vand.u32 3, %v573_v33  ;;  %v463_v24 = vand.u32 3, %v349_v25  ;;  %v801_v43 = vadd.s32 3, %v797_v36 }
  0xef   :  { %v335_v21 = vor.u32 %v334_v9, %v333_v12  ;;  %v338_v53 = vshll.u32 %v337_v13, 23  ;;  %v578_v38 = vand.u32 3, %v577_v26  ;;  %v911_v59 = vand.u32 3, %v797_v36 }
  0xf0   :  { %v354_v27 = vand.u32 3, %v353_v14  ;;  %vm689_vm13 = vcmp.eq.s32.totalorder %v687_v50, 0  ;;  %vm692_vm14 = vcmp.eq.s32.totalorder %v687_v50, 2  ;;  %vm464_vm0 = vcmp.lt.s32.totalorder %v463_v24, 2 }
  0xf1   :  { %v339_v44 = vor.u32 4788187, %v338_v53  ;;  %v342_v56 = vcvt.s32.f32 %v335_v21  ;;  %vm580_vm15 = vcmp.eq.s32.totalorder %v578_v38, 0  ;;  %vm465_vm1 = vcmp.eq.s32.totalorder %v463_v24, 0 }
  0xf2   :  { %vm583_vm2 = vcmp.eq.s32.totalorder %v578_v38, 2  ;;  %v802_v47 = vand.u32 3, %v801_v43  ;;  %vm468_vm3 = vcmp.eq.s32.totalorder %v463_v24, 2  ;;  %vm355_vm4 = vcmp.lt.s32.totalorder %v354_v27, 2 }
  0xf3   :  { %v340_v2 = vand.u32 2147483647, %v339_v44  ;;  %vm356_vm5 = vcmp.eq.s32.totalorder %v354_v27, 0  ;;  %vm359_vm6 = vcmp.eq.s32.totalorder %v354_v27, 2  ;;  %vm688_vm7 = vcmp.lt.s32.totalorder %v687_v50, 2 }
  0xf4   :  { %v1023_v58 = vpop.eup %1022  ;;  %vm579_vm8 = vcmp.lt.s32.totalorder %v578_v38, 2  ;;  %vm913_vm9 = vcmp.eq.s32.totalorder %v911_v59, 0 }
  0xf5   :  { %v343_v20 = vmul.f32 %v342_v56, %v340_v2  ;;  %v1025_v29 = vpop.eup %1024  ;;  %v584_v52 = vxor.u32 2147483648, %v1023_v58 }
  0xf6   :  { %v1027_v23 = vpop.eup %1026  ;;  %v581_v42 = vxor.u32 2147483648, %v1025_v29 }
  0xf7   :  { %v344_v15 = vxor.u32 2147483648, %v343_v20  ;;  %v1029_v41 = vpop.eup %1028  ;;  %v694_v54 = vsel %vm692_vm14, %v584_v52, %v1025_v29  ;;  %v585_v32 = vsel %vm583_vm2, %v584_v52, %v1025_v29  ;;  %v808_v55 = vxor.u32 2147483648, %v1027_v23 }
  0xf8   :  { %v691_v60 = vsel %vm689_vm13, %v1023_v58, %v581_v42  ;;  %v582_v63 = vsel %vm580_vm15, %v1023_v58, %v581_v42  ;;  %v805_v3 = vxor.u32 2147483648, %v1029_v41  ;;  %vm807_vm13 = vcmp.eq.s32.totalorder %v802_v47, 2 }
  0xf9   :  { %v345_v31 = vsel %vm262_vm10, %v344_v15, %v343_v20  ;;  %vm916_vm10 = vcmp.eq.s32.totalorder %v911_v59, 2  ;;  %v695_v12 = vsel %vm688_vm7, %v691_v60, %v694_v54  ;;  %v586_v9 = vsel %vm579_vm8, %v582_v63, %v585_v32 }
  0xfa   :  { %v348_v34 = vsel %vm261_vm11, %v1138_v30, %v345_v31  ;;  %vm804_vm11 = vcmp.eq.s32.totalorder %v802_v47, 0  ;;  %v915_v13 = vsel %vm913_vm9, %v1027_v23, %v805_v3  ;;  %v918_v16 = vsel %vm916_vm10, %v808_v55, %v1029_v41 }
  0xfb   :  { %1030 = vcosq.f32 %v348_v34  ;;  %v806_v21 = vsel %vm804_vm11, %v1027_v23, %v805_v3  ;;  %v809_v53 = vsel %vm807_vm13, %v808_v55, %v1029_v41  ;;  %vm576_vm14 = vweird.f32 %v1122_v8 }
  0xfc   :  { %1032 = vsinq.f32 %v348_v34  ;;  %v696_v22 = vsel %vm576_vm14, nan, %v695_v12  ;;  %v587_v44 = vsel %vm576_vm14, nan, %v586_v9  ;;  %vm912_vm15 = vcmp.lt.s32.totalorder %v911_v59, 2 }
  0xfd   :  { %v919_v30 = vsel %vm912_vm15, %v915_v13, %v918_v16  ;;  %vm368_vm2 = vcmask 392448   ;;  %vm925_vm7 = vcmask 1048448  }
 0x108   :  { %v1031_v45 = vpop.eup %1030 }
 0x109   :  { %v1033_v7 = vpop.eup %1032  ;;  %v360_v49 = vxor.u32 2147483648, %v1031_v45 }
 0x10a   :  { %v357_v51 = vxor.u32 2147483648, %v1033_v7 }
 0x10b   :  { %v470_v37 = vsel %vm468_vm3, %v360_v49, %v1033_v7  ;;  %v361_v57 = vsel %vm359_vm6, %v360_v49, %v1033_v7  ;;  %vm477_vm3 = vcmask 523648   ;;  %vm816_vm6 = vcmask 917248  }
 0x10c   :  { %v467_v0 = vsel %vm465_vm1, %v1031_v45, %v357_v51  ;;  %v358_v1 = vsel %vm356_vm5, %v1031_v45, %v357_v51  ;;  %vm253_vm1 = vcmask 261248   ;;  %vm701_vm5 = vcmask 786048  }
 0x10d   :  { %v471_v4 = vsel %vm464_vm0, %v467_v0, %v470_v37  ;;  %v362_v5 = vsel %vm355_vm4, %v358_v1, %v361_v57  ;;  %vm800_vm0 = vweird.f32 %v1134_v19  ;;  %vm592_vm4 = vcmask 654848  }
 0x10e   :  { %v472_v11 = vsel %vm352_vm12, nan, %v471_v4  ;;  %v363_v6 = vsel %vm352_vm12, nan, %v362_v5  ;;  %vm803_vm12 = vcmp.lt.s32.totalorder %v802_v47, 2  ;;  %v920_v62 = vsel %vm800_vm0, nan, %v919_v30 }
 0x10f   :  { %474 = vrot.lane.b32.xlu1 %v472_v11, %s1092_s1  ;;  %365 = vrot.lane.b32.xlu0 %v363_v6, %s1079_s13  ;;  %v810_v61 = vsel %vm803_vm12, %v806_v21, %v809_v53 }
 0x110   :  { %v811_v2 = vsel %vm800_vm0, nan, %v810_v61 }
 0x113   :  { %698 = vrot.lane.b32.xlu1 %v696_v22, %s1093_s19  ;;  %589 = vrot.lane.b32.xlu0 %v587_v44, %s1094_s20 }
 0x117   :  { %922 = vrot.lane.b32.xlu1 %v920_v62, %s1095_s21  ;;  %813 = vrot.lane.b32.xlu0 %v811_v2, %s1096_s22 }
 0x15f   :  { %v251_v8 = vpop.permute.xlu1 %250 }
 0x160   :  { %254 = vst.msk [vmem:[#allocation5] sm:$0xff] %vm253_vm1, %v251_v8 }
 0x181   :  { %v475_v56 = vpop.permute.xlu1 %474  ;;  %v366_v17 = vpop.permute.xlu0 %365 }
 0x182   :  { %369 = vst.msk [vmem:[#allocation5] sm:$0xff] %vm368_vm2, %v366_v17 }
 0x183   :  { %478 = vst.msk [vmem:[#allocation5] sm:$0xff] %vm477_vm3, %v475_v56 }
 0x185   :  { %v699_v20 = vpop.permute.xlu1 %698  ;;  %v590_v39 = vpop.permute.xlu0 %589 }
 0x186   :  { %593 = vst.msk [vmem:[#allocation5] sm:$0xff] %vm592_vm4, %v590_v39 }
 0x187   :  { %702 = vst.msk [vmem:[#allocation5] sm:$0xff] %vm701_vm5, %v699_v20 }
 0x189   :  { %v923_v19 = vpop.permute.xlu1 %922  ;;  %v814_v46 = vpop.permute.xlu0 %813 }
 0x18a   :  { %817 = vst.msk [vmem:[#allocation5] sm:$0xff] %vm816_vm6, %v814_v46 }
 0x18b   :  { %926 = vst.msk [vmem:[#allocation5] sm:$0xff] %vm925_vm7, %v923_v19 }
 0x18c   :  { %931 = vsyncadd [#allocation4], 96  ;;  %s1097_s23 = smov [#allocation5]  }
 0x18d   :  { %s932_s24 = sshll.u32 %s1097_s23, 4  ;;  %s933_s24 = int_to_ptr.vmem [resolvable:$true] %s932_s24 }
 0x18e   :  { %s1054_s25 = scalar_lea.vmem %s933_s24, 32  ;;  %s1058_s26 = scalar_lea.vmem %s933_s24, 128 }
 0x18f   :  { %p1055_p5 = scmp.ne.s32.totalorder %s933_s24, %s1054_s25  ;;  %p1059_p6 = scmp.lt.s32.totalorder %s933_s24, %s933_s24 }
 0x190   :  { %p1060_p7 = scmp.lt.s32.totalorder %s1058_s26, %s1054_s25 }
 0x192   :  { %p1061_p8 = por %p1060_p7, %p1059_p6 }
 0x194   :  { %p1062_p9 = pnand %p1061_p8, %p1055_p5 }
 0x196   :  { %1065 = shalt.err (!%p1062_p9)
}
 0x197   :  { %938 = dma.vmem_to_hbm [thread:$0]  %s933_s24, 32, %s1405_s2, [#allocation4], %s1079_s13, %s1079_s13, %s1080_s14  }
 0x198   :  { %1076 = dma.done.wait [#allocation4], 128  }
 0x199   :  { %1077 = vsyncadd [#allocation4], 4294967168 }
 0x19a   :  { %942 = vsyncpa [#allocation3], 1 }
 0x19b   :  { %943 = vsyncpa [#allocation4], 1 }

</bundles_post_ra>
